<compile_context>
chip_gen: v6e
topology: v6e:2x2x1
jax: 0.10.0
libtpu: 0.0.40
codegen_flags: <defaults>
</compile_context>

<pallas_src>
import functools

import jax
import jax.numpy as jnp
from jax.experimental import pallas as pl
from jax.experimental.pallas import tpu as pltpu


def _round_up(x: int, m: int) -> int:
    return ((x + m - 1) // m) * m


def _cdiv(a: int, b: int) -> int:
    return -(-a // b)


# Weight larger than this is not kept resident in VMEM (use K-tiled fallback).
_RESIDENT_W_BYTES_MAX = 8 * 1024 * 1024
# Conservative VMEM working-set budget: safe on v7x (64 MiB) and v5e/v6e.
_VMEM_BUDGET = 48 * 1024 * 1024


# --------------------------------------------------------------------------- #
# Kernels
# --------------------------------------------------------------------------- #
def _linear_resident_kernel(x_ref, w_ref, b_ref, o_ref):
    """One (tm, D) @ (D, N_pad) MXU matmul; W/bias are VMEM-resident."""
    o_ref[...] = (
        jnp.dot(x_ref[...], w_ref[...], preferred_element_type=jnp.float32)
        + b_ref[...]
    ).astype(o_ref.dtype)


def _linear_ktiled_kernel(x_ref, w_ref, b_ref, o_ref, acc_ref):
    """K-tiled fallback: (tm, tk) @ (tk, N_pad) with f32 accumulator scratch."""
    k = pl.program_id(1)

    @pl.when(k == 0)
    def _init():
        acc_ref[...] = jnp.zeros_like(acc_ref)

    acc_ref[...] += jnp.dot(
        x_ref[...], w_ref[...], preferred_element_type=jnp.float32
    )

    @pl.when(k == pl.num_programs(1) - 1)
    def _finalize():
        o_ref[...] = (acc_ref[...] + b_ref[...]).astype(o_ref.dtype)


# --------------------------------------------------------------------------- #
# One-time parameter preparation (hoisted out of the per-batch forward)
# --------------------------------------------------------------------------- #
def prepare_params(w, b, *, param_dtype=jnp.bfloat16):
    """w: (N, D) torch-layout weight, b: (N,).

    Returns (w_t_padded, bias_padded, N):
      w_t_padded: (D, N_pad) in param_dtype, N_pad = round_up(N, 128)
      bias_padded: (1, N_pad) float32
    Padded columns are zero, so results are unchanged after slicing back to N.
    """
    N, D = w.shape
    assert b.shape == (N,)
    N_pad = _round_up(N, 128)          # lane-dense output -> unmasked stores
    w_t = w.T                          # (D, N)
    b2 = b
    if N_pad != N:
        w_t = jnp.pad(w_t, ((0, 0), (0, N_pad - N)))
        b2 = jnp.pad(b2, (0, N_pad - N))
    wp = w_t.astype(param_dtype)
    bp = b2.reshape(1, N_pad).astype(jnp.float32)
    return wp, bp, N


def _pick_batch_tiling(B, target, tm_cap):
    """Minimal-padding batch tiling; >= 2 tiles when possible (v7x megacore)."""
    target = max(8, min(target, tm_cap))
    n_tiles = max(1, _cdiv(B, target))
    if n_tiles == 1 and B > 8:
        n_tiles = 2
    tm = min(_round_up(_cdiv(B, n_tiles), 8), tm_cap)
    tm = max(8, tm)
    B_pad = _round_up(max(B, 8), tm)
    return tm, B_pad


# --------------------------------------------------------------------------- #
# Forward
# --------------------------------------------------------------------------- #
def logistic_regression_forward(x, wp, bp, n_out=None, *,
                                compute_dtype=jnp.bfloat16):
    """x: (B, D) activations; wp: (D, N_pad), bp: (1, N_pad) from prepare_params.

    Returns (B, n_out) float32 logits, identical (up to bf16 rounding) to
    x @ W^T + b of the original nn.Linear.
    """
    B, D = x.shape
    D2, N_pad = wp.shape
    assert D == D2 and N_pad % 128 == 0 and bp.shape == (1, N_pad)
    if n_out is None:
        n_out = N_pad

    out_dtype = jnp.float32
    x_bytes = jnp.dtype(compute_dtype).itemsize
    w_bytes = jnp.dtype(wp.dtype).itemsize
    o_bytes = jnp.dtype(out_dtype).itemsize

    xc = x.astype(compute_dtype)

    w_vmem = D * N_pad * w_bytes
    use_resident = w_vmem <= _RESIDENT_W_BYTES_MAX

    if use_resident:
        # ---- fast path: W resident in VMEM, 1-D batch grid -----------------
        # Largest batch tile that fits the VMEM budget (double-buffered x/out,
        # weight counted twice to be conservative about pipeline buffering).
        per_row_bytes = 2 * (D * x_bytes + N_pad * o_bytes)
        tm_cap = max(8, ((_VMEM_BUDGET - 2 * w_vmem) // per_row_bytes) // 8 * 8)
        tm, B_pad = _pick_batch_tiling(B, 512, tm_cap)

        xp = xc if B_pad == B else jnp.pad(xc, ((0, B_pad - B), (0, 0)))

        vmem_needed = (
            2 * tm * D * x_bytes        # x tiles (double-buffered)
            + 2 * w_vmem                # resident weight
            + 2 * tm * N_pad * o_bytes  # output tiles (double-buffered)
            + 2 * 8 * N_pad * 4         # bias ((8,128)-rounded layout)
        )
        vmem_limit = int(min(max(vmem_needed + (4 << 20), 16 << 20), 64 << 20))

        cost = pl.CostEstimate(
            flops=2 * B_pad * D * N_pad,
            transcendentals=0,
            bytes_accessed=int(B_pad * D * x_bytes + w_vmem
                               + B_pad * N_pad * o_bytes),
        )

        out = pl.pallas_call(
            _linear_resident_kernel,
            out_shape=jax.ShapeDtypeStruct((B_pad, N_pad), out_dtype),
            grid_spec=pltpu.PrefetchScalarGridSpec(
                num_scalar_prefetch=0,
                grid=(B_pad // tm,),
                in_specs=[
                    pl.BlockSpec((tm, D), lambda i: (i, 0)),       # x tile
                    pl.BlockSpec((D, N_pad), lambda i: (0, 0)),    # W (resident)
                    pl.BlockSpec((1, N_pad), lambda i: (0, 0)),    # bias
                ],
                out_specs=pl.BlockSpec((tm, N_pad), lambda i: (i, 0)),
            ),
            compiler_params=pltpu.CompilerParams(
                dimension_semantics=("parallel",),
                vmem_limit_bytes=vmem_limit,
            ),
            cost_estimate=cost,
        )(xp, wp, bp)
    else:
        # ---- fallback: huge D*N weight -> K-tiled reduction grid ------------
        # TODO(synk): this path re-pads x/W along D per call; for steady-state
        # use with huge weights, hoist the D padding into prepare_params.
        tk = min(_round_up(D, 128), 2048)
        D_pad = _round_up(D, tk)
        tm, B_pad = _pick_batch_tiling(B, 512, 1024)

        xp = xc
        if B_pad != B or D_pad != D:
            xp = jnp.pad(xc, ((0, B_pad - B), (0, D_pad - D)))
        wpp = wp if D_pad == D else jnp.pad(wp, ((0, D_pad - D), (0, 0)))

        n_btiles = B_pad // tm
        vmem_needed = (
            2 * tm * tk * x_bytes
            + 2 * tk * N_pad * w_bytes
            + 2 * tm * N_pad * o_bytes
            + 2 * 8 * N_pad * 4
            + tm * N_pad * 4            # accumulator scratch
        )
        vmem_limit = int(min(max(vmem_needed + (4 << 20), 32 << 20), 64 << 20))

        cost = pl.CostEstimate(
            flops=2 * B_pad * D_pad * N_pad,
            transcendentals=0,
            bytes_accessed=int(B_pad * D_pad * x_bytes
                               + n_btiles * D_pad * N_pad * w_bytes
                               + B_pad * N_pad * o_bytes),
        )

        out = pl.pallas_call(
            _linear_ktiled_kernel,
            out_shape=jax.ShapeDtypeStruct((B_pad, N_pad), out_dtype),
            grid_spec=pltpu.PrefetchScalarGridSpec(
                num_scalar_prefetch=0,
                grid=(n_btiles, D_pad // tk),
                in_specs=[
                    pl.BlockSpec((tm, tk), lambda i, k: (i, k)),     # x tile
                    pl.BlockSpec((tk, N_pad), lambda i, k: (k, 0)),  # W tile
                    pl.BlockSpec((1, N_pad), lambda i, k: (0, 0)),   # bias
                ],
                out_specs=pl.BlockSpec((tm, N_pad), lambda i, k: (i, 0)),
                scratch_shapes=[pltpu.VMEM((tm, N_pad), jnp.float32)],
            ),
            compiler_params=pltpu.CompilerParams(
                dimension_semantics=("parallel", "arbitrary"),
                vmem_limit_bytes=vmem_limit,
            ),
            cost_estimate=cost,
        )(xp, wpp, bp)

    return out[:B, :n_out]


# --------------------------------------------------------------------------- #
# Demo / correctness check
# --------------------------------------------------------------------------- #
if __name__ == "__main__":
    # Small shapes consistent with the module: input_dim features -> output_dim logits.
    B, input_dim, output_dim = 8, 128, 16

    key = jax.random.PRNGKey(0)
    kx, kw, kb = jax.random.split(key, 3)

    # Deterministic parameter init mimicking torch.nn.Linear default
    # (uniform in [-1/sqrt(in_features), 1/sqrt(in_features)]).
    bound = 1.0 / jnp.sqrt(jnp.float32(input_dim))
    w = jax.random.uniform(kw, (output_dim, input_dim), jnp.float32, -bound, bound)
    b = jax.random.uniform(kb, (output_dim,), jnp.float32, -bound, bound)
    x = jax.random.normal(kx, (B, input_dim), jnp.float32)

    # One-time parameter prep (transpose + N-pad + bf16 cast), hoisted out of
    # the per-batch forward as recommended.
    wp, bp, n_out = prepare_params(w, b)

    fwd = jax.jit(functools.partial(logistic_regression_forward, n_out=n_out))
    out = fwd(x, wp, bp)
    out = jax.block_until_ready(out)

    # Reference check in plain JAX (f32); bf16 streaming -> looser tolerance.
    ref = x @ w.T + b
    assert out.shape == (B, output_dim)
    assert jnp.allclose(out, ref, atol=5e-2, rtol=5e-2), float(
        jnp.max(jnp.abs(out - ref)))

    print("KERNEL_OK")
</pallas_src>

<mosaic_0001>
module attributes {stable_mosaic.version = 11 : i64} {
  func.func @_linear_resident_kernel(%arg0: i32, %arg1: memref<8x128xbf16, #tpu.memory_space<vmem>>, %arg2: memref<128x128xbf16, #tpu.memory_space<vmem>>, %arg3: memref<1x128xf32, #tpu.memory_space<vmem>>, %arg4: memref<8x128xf32, #tpu.memory_space<vmem>>) attributes {dimension_semantics = [#tpu.dimension_semantics<parallel>], iteration_bounds = array<i64: 1>, scalar_prefetch = 0 : i64, scratch_operands = 0 : i64, tpu.core_type = #tpu.core_type<tc>, window_params = [{transform_indices = @transform_0, window_bounds = array<i64: 8, 128>}, {pipeline_mode = #tpu.pipeline_mode<synchronous>, transform_indices = @transform_1, window_bounds = array<i64: 128, 128>}, {pipeline_mode = #tpu.pipeline_mode<synchronous>, transform_indices = @transform_2, window_bounds = array<i64: 1, 128>}, {transform_indices = @transform_3, window_bounds = array<i64: 8, 128>}]} {
    %c0 = arith.constant 0 : index
    %c0_0 = arith.constant 0 : index
    %0 = vector.load %arg1[%c0, %c0_0] : memref<8x128xbf16, #tpu.memory_space<vmem>>, vector<8x128xbf16>
    %c0_1 = arith.constant 0 : index
    %c0_2 = arith.constant 0 : index
    %1 = vector.load %arg2[%c0_1, %c0_2] : memref<128x128xbf16, #tpu.memory_space<vmem>>, vector<128x128xbf16>
    %cst = arith.constant dense<0.000000e+00> : vector<8x128xf32>
    %2 = tpu.matmul %0, %1, %cst {dimension_numbers = #tpu.dot_dimension_numbers<[1], [0], [0], [1], [0, 0, 1, 1], [], []>} : vector<8x128xbf16>, vector<128x128xbf16>, vector<8x128xf32> -> vector<8x128xf32>
    %c0_3 = arith.constant 0 : index
    %c0_4 = arith.constant 0 : index
    %3 = vector.load %arg3[%c0_3, %c0_4] : memref<1x128xf32, #tpu.memory_space<vmem>>, vector<1x128xf32>
    %4 = vector.broadcast %3 : vector<1x128xf32> to vector<8x128xf32>
    %5 = arith.addf %2, %4 : vector<8x128xf32>
    %c0_5 = arith.constant 0 : index
    %c0_6 = arith.constant 0 : index
    %6 = vector.load %arg4[%c0_5, %c0_6] : memref<8x128xf32, #tpu.memory_space<vmem>>, vector<8x128xf32>
    tpu.vector_store %arg4[%c0_5, %c0_6], %5 {strides = array<i32>} : memref<8x128xf32, #tpu.memory_space<vmem>>, vector<8x128xf32>,
    return
  }
  func.func @transform_0(%arg0: i32) -> (i32, i32) {
    %c0_i32 = arith.constant 0 : i32
    %c0_i32_0 = arith.constant 0 : i32
    return %arg0, %c0_i32 : i32, i32
  }
  func.func @transform_1(%arg0: i32) -> (i32, i32) {
    %c0_i32 = arith.constant 0 : i32
    %c0_i32_0 = arith.constant 0 : i32
    %c0_i32_1 = arith.constant 0 : i32
    return %c0_i32, %c0_i32_0 : i32, i32
  }
  func.func @transform_2(%arg0: i32) -> (i32, i32) {
    %c0_i32 = arith.constant 0 : i32
    %c0_i32_0 = arith.constant 0 : i32
    %c0_i32_1 = arith.constant 0 : i32
    return %c0_i32, %c0_i32_0 : i32, i32
  }
  func.func @transform_3(%arg0: i32) -> (i32, i32) {
    %c0_i32 = arith.constant 0 : i32
    %c0_i32_0 = arith.constant 0 : i32
    return %arg0, %c0_i32 : i32, i32
  }
}

</mosaic_0001>

<bundles_post_ra>
// kernel: logistic_regression_forward.1
= control target key start
LH: loop header
LB: loop body
LE: loop exit
PB: predicated region body
PF: predicated region fallthrough
CT: control target
= control target key end

     0   :  { %8 = vsyncpa [#allocation3], 0  ;;  %s292_s0 = inlined_call_operand.vmem [shape: bf16[8,128], index: 0, kind: input, shape index: {}]   ;;  %s293_s1 = inlined_call_operand.hbm [shape: bf16[128,128], index: 1, kind: input, shape index: {}]   ;;  %s294_s2 = inlined_call_operand.vmem [shape: f32[1,128], index: 2, kind: input, shape index: {}]   ;;  %s295_s3 = inlined_call_operand.hbm [shape: f32[8,128], index: 3, kind: output, shape index: {}]  }
   0x1   :  { %9 = vsyncpa [#allocation4], 0  ;;  %s254_s12 = smov [#allocation2]  }
   0x2   :  { %s17_s13 = sshll.u32 %s254_s12, 4  ;;  %s18_s13 = int_to_ptr.vmem [resolvable:$true] %s17_s13 }
   0x3   :  { %s218_s14 = scalar_lea.vmem %s18_s13, 1024  ;;  %p223_p1 = scmp.lt.s32.totalorder %s18_s13, %s18_s13 }
   0x4   :  { %p219_p0 = scmp.ne.s32.totalorder %s18_s13, %s218_s14  ;;  %p224_p2 = scmp.lt.s32.totalorder %s218_s14, %s218_s14 }
   0x6   :  { %p225_p3 = por %p224_p2, %p223_p1 }
   0x8   :  { %p226_p4 = pnand %p225_p3, %p219_p0 }
   0xa   :  { %229 = shalt.err (!%p226_p4)
}
   0xb   :  { %s255_s15 = smov 64   ;;  %s256_s16 = smov 4  }
   0xc   :  { %23 = dma.hbm_to_vmem [thread:$0]  %s293_s1, 1024, %s18_s13, [#allocation3], %s255_s15, %s255_s15, %s256_s16  }
   0xd   :  { %250 = dma.done.wait [#allocation3], 1024  }
   0xe   :  { %251 = vsyncadd [#allocation3], 4294966272  ;;  %v257_v0 = vmov 0.0   ;;  %vm258_vm0 = vmmov 0   ;;  %v202_v1 = vld [vmem:[#allocation2 + $0x38] sm:$0xff]   ;;  %v203_v2 = vld [vmem:[#allocation2 + $0x30] sm:$0xff]  }
   0xf   :  { %176 = vmatprep.subr.bf16.mxu0 %v257_v0  ;;  %192 = vmatprep.mubr.msk.bf16.mxu0 %vm258_vm0, %v257_v0  ;;  %v204_v3 = vld [vmem:[#allocation2 + $0x28] sm:$0xff]   ;;  %v205_v4 = vld [vmem:[#allocation2 + $0x20] sm:$0xff]   ;;  %v206_v5 = vld [vmem:[#allocation2 + $0x18] sm:$0xff]   ;;  %s259_s22 = smov [#allocation5]  }
  0x10   :  { %177 = vmatpush3.bf16.msra.mxu0 %v202_v1  ;;  %v207_v6 = vld [vmem:[#allocation2 + $0x10] sm:$0xff]   ;;  %v208_v7 = vld [vmem:[#allocation2 + $0x8] sm:$0xff]   ;;  %v209_v8 = vld [vmem:[#allocation2] sm:$0xff]   ;;  %s149_s23 = sshll.u32 %s259_s22, 4  ;;  %s150_s23 = int_to_ptr.vmem [resolvable:$true] %s149_s23 }
  0x11   :  { %178 = vmatprep.subr.bf16.mxu0 %v257_v0  ;;  %v30_v9 = vld [vmem:[%s292_s0] sm:$0xf]  ;;  %s230_s24 = scalar_lea.vmem %s150_s23, 128  ;;  %p235_p6 = scmp.lt.s32.totalorder %s150_s23, %s150_s23 }
  0x12   :  { %v158_v10 = vld [vmem:[%s294_s2] ss:$0 sm:$0xff]  ;;  %p231_p5 = scmp.ne.s32.totalorder %s150_s23, %s230_s24  ;;  %p236_p7 = scmp.lt.s32.totalorder %s230_s24, %s230_s24 }
  0x14   :  { %179 = vmatpush3.bf16.msra.mxu0 %v203_v2  ;;  %p237_p8 = por %p236_p7, %p235_p6 }
  0x15   :  { %180 = vmatprep.subr.bf16.mxu0 %v257_v0 }
  0x16   :  { %p238_p9 = pnand %p237_p8, %p231_p5 }
  0x18   :  { %181 = vmatpush3.bf16.msra.mxu0 %v204_v3 }
  0x19   :  { %182 = vmatprep.subr.bf16.mxu0 %v257_v0 }
  0x1c   :  { %183 = vmatpush3.bf16.msra.mxu0 %v205_v4 }
  0x1d   :  { %184 = vmatprep.subr.bf16.mxu0 %v257_v0 }
  0x20   :  { %185 = vmatpush3.bf16.msra.mxu0 %v206_v5 }
  0x21   :  { %186 = vmatprep.subr.bf16.mxu0 %v257_v0 }
  0x24   :  { %187 = vmatpush3.bf16.msra.mxu0 %v207_v6 }
  0x25   :  { %188 = vmatprep.subr.bf16.mxu0 %v257_v0 }
  0x28   :  { %189 = vmatpush3.bf16.msra.mxu0 %v208_v7 }
  0x29   :  { %190 = vmatprep.subr.bf16.mxu0 %v257_v0 }
  0x2c   :  { %191 = vmatpush3.bf16.msra.mxu0 %v209_v8 }
  0x2f   :  { %193 = vmatmul.mubr.bf16.vlgmr.msra.gmra.mxu0 %v30_v9 }
  0xef   :  { %v136_v11 = vpop.f32.mrf.mxu0 }
  0xf0   :  { %v137_v12 = vadd.f32 %v158_v10, %v136_v11 }
  0xf1   :  { %v194_v13 = vpop.f32.mrf.mxu0 }
  0xf2   :  { %142 = vst [vmem:[#allocation5] sm:$0xff] %v137_v12 }
  0xf3   :  { %v139_v14 = vpop.f32.mrf.mxu0 }
  0xf4   :  { %241 = shalt.err (!%p238_p9)
}
  0xf5   :  { %152 = dma.vmem_to_hbm [thread:$0]  %s150_s23, 128, %s295_s3, [#allocation4]   ;;  %v195_v15 = vpop.f32.mrf.mxu0 }
  0xf6   :  { %252 = dma.done.wait [#allocation4], 128  }
  0xf7   :  { %253 = vsyncadd [#allocation4], 4294967168 }
  0xf8   :  { %156 = vsyncpa [#allocation3], 1 }
  0xf9   :  { %157 = vsyncpa [#allocation4], 1 }

</bundles_post_ra>
